<compile_context>
chip_gen: v7x
topology: tpu7x:2x2x1
jax: 0.10.0
libtpu: 0.0.40
codegen_flags: <defaults>
</compile_context>

<pallas_src>
import functools

import jax
import jax.numpy as jnp
from jax.experimental import pallas as pl
from jax.experimental.pallas import tpu as pltpu

KSIZE = 5
PAD = 2


def _round_up(x, m):
    return (x + m - 1) // m * m


def _choose_block_batch(n_groups, length, cp, target_rows=1024,
                        vmem_budget_bytes=24 << 20):
    """Pick how many lane-groups each grid step processes.

    Sized so the matmul M-dim is ~target_rows and the per-block VMEM live set
    (double-buffered in/out blocks + in-kernel temporaries) stays well under the
    32 MiB scoped default (safe on v5e/v6e 128 MiB and v7x 64 MiB physical).
    One big block is preferred: grid steps are a serial loop on 1-TC chips.
    """
    lp = _round_up(length + 2 * PAD, 8)
    per_group_bytes = (
        4 * length * cp * 4     # 2x input + 2x output double buffers (f32)
        + lp * cp * 2           # padded mm_dtype activation copy
        + 2 * length * cp * 4)  # f32 tap accumulator + intermediate h
    nb = max(1, min(n_groups, max(1, target_rows // max(length, 1))))
    nb = min(nb, max(1, vmem_budget_bytes // max(per_group_bytes, 1)))
    nb = max(1, min(nb, n_groups))
    while n_groups % nb != 0:   # block count must divide the group count
        nb -= 1
    return nb


def _pack_conv_weight(w, g, c_pad, dtype, scale=1.0):
    """PyTorch Conv1d weight (Cout, Cin, K) -> per-tap block-diagonal weights.

    Returns Wp of shape (K, c_pad, c_pad) where, for each tap k, Wp[k] is a
    block-diagonal matrix with g copies of (w[:, :, k].T * scale) on the
    diagonal (one block per batch sample packed into the lane dimension),
    zero-padded to c_pad lanes.
    """
    cout, cin, k = w.shape
    wt = jnp.transpose(w, (2, 1, 0)).astype(jnp.float32) * scale   # (K, Cin, Cout)
    eye = jnp.eye(g, dtype=jnp.float32)
    blk = jnp.einsum("ab,kio->kaibo", eye, wt).reshape(k, g * cin, g * cout)
    blk = jnp.pad(blk, ((0, 0), (0, c_pad - g * cin), (0, c_pad - g * cout)))
    return blk.astype(dtype)


def _pack_bias(b, g, c_pad, scale=1.0):
    c = b.shape[0]
    bb = jnp.tile(b.astype(jnp.float32) * scale, g)                # (g*C,)
    return jnp.pad(bb, (0, c_pad - g * c)).reshape(1, c_pad)


def _resblock_kernel(x_ref, w1_ref, b1_ref, w2_ref, b2_ref, o_ref, *, mm_dtype):
    # x_ref : (nb, L, cp)  f32   packed NLC (g batch samples per 128 lanes)
    # w*_ref: (K, cp, cp)  mm_dtype per-tap block-diagonal weights
    # b*_ref: (1, cp)      f32   (layer-2 weight/bias already carry the 0.3)
    # o_ref : (nb, L, cp)  f32
    nb, length, cp = x_ref.shape
    lp = _round_up(length + 2 * PAD, 8)        # sublane-aligned padded length
    x = x_ref[...]

    def conv(act_f32, w_ref, b_ref):
        # Cast ONCE to the matmul dtype before the shifted-tap copies so every
        # slice/concat moves half-width data (bf16 path).
        act = act_f32.astype(mm_dtype)
        zfront = jnp.zeros((nb, PAD, cp), mm_dtype)
        zback = jnp.zeros((nb, lp - length - PAD, cp), mm_dtype)
        ap = jnp.concatenate([zfront, act, zback], axis=1)   # (nb, lp, cp)
        acc = jnp.zeros((nb * length, cp), jnp.float32)
        # Tap accumulation: 5 matmuls with K = cp (128), f32 accumulation on
        # the MXU; no 5x-sized im2col window is ever materialized.
        for k in range(KSIZE):
            tap = ap[:, k:k + length, :].reshape(nb * length, cp)
            acc = acc + jnp.dot(tap, w_ref[k],
                                preferred_element_type=jnp.float32)
        return (acc + b_ref[...]).reshape(nb, length, cp)

    h = conv(jnp.maximum(x, 0.0), w1_ref, b1_ref)   # ReLU -> conv1
    h = conv(jnp.maximum(h, 0.0), w2_ref, b2_ref)   # ReLU -> conv2 (x0.3 folded)
    o_ref[...] = x + h                              # residual (scale already in h)


def resblock_pallas(x, w1, b1, w2, b2, *, block_groups=None,
                    matmul_dtype=jnp.bfloat16):
    """x: (N, C, L) (PyTorch NCL). w*: (C, C, 5). b*: (C,). Returns (N, C, L) f32."""
    n, c, length = x.shape

    # Pack g batch samples into the 128 lanes when C divides 128 (lane-dense
    # real data instead of zero padding); otherwise fall back to channel pad.
    if c < 128 and 128 % c == 0:
        g = 128 // c
    else:
        g = 1
    n_pad = _round_up(n, g)
    n_groups = n_pad // g
    cg = g * c
    cp = _round_up(cg, 128)

    # NCL f32 -> packed NLC (n_groups, L, cp): one fused XLA transpose pass.
    xf = x.astype(jnp.float32)
    if n_pad != n:
        xf = jnp.pad(xf, ((0, n_pad - n), (0, 0), (0, 0)))
    x_pack = xf.reshape(n_groups, g, c, length)
    x_pack = jnp.transpose(x_pack, (0, 3, 1, 2)).reshape(n_groups, length, cg)
    if cp != cg:
        x_pack = jnp.pad(x_pack, ((0, 0), (0, 0), (0, cp - cg)))

    # Block-diagonal per-tap weights; fold the 0.3 residual scale into layer 2.
    w1p = _pack_conv_weight(w1, g, cp, matmul_dtype)
    w2p = _pack_conv_weight(w2, g, cp, matmul_dtype, scale=0.3)
    b1p = _pack_bias(b1, g, cp)
    b2p = _pack_bias(b2, g, cp, scale=0.3)

    nb = (block_groups if block_groups is not None
          else _choose_block_batch(n_groups, length, cp))
    assert n_groups % nb == 0
    grid = (n_groups // nb,)

    kernel = functools.partial(_resblock_kernel, mm_dtype=matmul_dtype)

    # NOTE: the weight/bias index_maps are constant, so Pallas never re-DMAs
    # them across grid steps (at cp=128 they are ~160 KiB each, negligible).
    out = pl.pallas_call(
        kernel,
        out_shape=jax.ShapeDtypeStruct((n_groups, length, cp), jnp.float32),
        grid_spec=pltpu.PrefetchScalarGridSpec(
            num_scalar_prefetch=0,
            grid=grid,
            in_specs=[
                pl.BlockSpec((nb, length, cp), lambda i: (i, 0, 0)),
                pl.BlockSpec((KSIZE, cp, cp), lambda i: (0, 0, 0)),
                pl.BlockSpec((1, cp), lambda i: (0, 0)),
                pl.BlockSpec((KSIZE, cp, cp), lambda i: (0, 0, 0)),
                pl.BlockSpec((1, cp), lambda i: (0, 0)),
            ],
            out_specs=pl.BlockSpec((nb, length, cp), lambda i: (i, 0, 0)),
        ),
        compiler_params=pltpu.CompilerParams(
            dimension_semantics=("parallel",)),
    )(x_pack, w1p, b1p, w2p, b2p)

    # Unpack lanes back to (N, C, L): single fused XLA pass.
    y = out[:, :, :cg].reshape(n_groups, length, g, c)
    y = jnp.transpose(y, (0, 2, 3, 1)).reshape(n_pad, c, length)
    return y[:n]


def resblock_ref(x, w1, b1, w2, b2):
    """Pure-JAX reference matching the PyTorch forward (NCL layout)."""
    def conv1d(h, w, b):
        y = jax.lax.conv_general_dilated(
            h, w, window_strides=(1,), padding=((PAD, PAD),),
            dimension_numbers=("NCH", "OIH", "NCH"))
        return y + b[None, :, None]

    h = jnp.maximum(x, 0.0)
    h = conv1d(h, w1, b1)
    h = jnp.maximum(h, 0.0)
    h = conv1d(h, w2, b2)
    return x + 0.3 * h


if __name__ == "__main__":
    # Small shapes: batch=2, hidden(channels)=32, seq length=8.
    N, HIDDEN, L = 2, 32, 8

    key = jax.random.PRNGKey(0)
    kx, k1, k2, k3, k4 = jax.random.split(key, 5)

    x = jax.random.normal(kx, (N, HIDDEN, L), dtype=jnp.float32)
    w1 = 0.1 * jax.random.normal(k1, (HIDDEN, HIDDEN, KSIZE), dtype=jnp.float32)
    b1 = 0.1 * jax.random.normal(k2, (HIDDEN,), dtype=jnp.float32)
    w2 = 0.1 * jax.random.normal(k3, (HIDDEN, HIDDEN, KSIZE), dtype=jnp.float32)
    b2 = 0.1 * jax.random.normal(k4, (HIDDEN,), dtype=jnp.float32)

    ref = resblock_ref(x, w1, b1, w2, b2)

    # f32 matmul-input path: tight tolerance.
    out_f32 = jax.block_until_ready(
        resblock_pallas(x, w1, b1, w2, b2, matmul_dtype=jnp.float32))
    assert out_f32.shape == (N, HIDDEN, L)
    assert jnp.allclose(out_f32, ref, atol=1e-4, rtol=1e-4), (
        f"f32 path max abs err {jnp.max(jnp.abs(out_f32 - ref))}")

    # Fast path (bf16 MXU inputs, f32 accumulation): looser tolerance.
    out_bf16 = jax.block_until_ready(
        resblock_pallas(x, w1, b1, w2, b2, matmul_dtype=jnp.bfloat16))
    assert out_bf16.shape == (N, HIDDEN, L)
    assert jnp.allclose(out_bf16, ref, atol=5e-2, rtol=5e-2), (
        f"bf16 path max abs err {jnp.max(jnp.abs(out_bf16 - ref))}")

    print("KERNEL_OK")
</pallas_src>

<mosaic_0001>
module attributes {stable_mosaic.version = 11 : i64} {
  func.func @_resblock_kernel(%arg0: i32, %arg1: memref<1x8x128xf32, #tpu.memory_space<vmem>>, %arg2: memref<5x128x128xf32, #tpu.memory_space<vmem>>, %arg3: memref<1x128xf32, #tpu.memory_space<vmem>>, %arg4: memref<5x128x128xf32, #tpu.memory_space<vmem>>, %arg5: memref<1x128xf32, #tpu.memory_space<vmem>>, %arg6: memref<1x8x128xf32, #tpu.memory_space<vmem>>) attributes {dimension_semantics = [#tpu.dimension_semantics<parallel>], iteration_bounds = array<i64: 1>, scalar_prefetch = 0 : i64, scratch_operands = 0 : i64, tpu.core_type = #tpu.core_type<tc>, window_params = [{transform_indices = @transform_0, window_bounds = array<i64: 1, 8, 128>}, {pipeline_mode = #tpu.pipeline_mode<synchronous>, transform_indices = @transform_1, window_bounds = array<i64: 5, 128, 128>}, {pipeline_mode = #tpu.pipeline_mode<synchronous>, transform_indices = @transform_2, window_bounds = array<i64: 1, 128>}, {pipeline_mode = #tpu.pipeline_mode<synchronous>, transform_indices = @transform_3, window_bounds = array<i64: 5, 128, 128>}, {pipeline_mode = #tpu.pipeline_mode<synchronous>, transform_indices = @transform_4, window_bounds = array<i64: 1, 128>}, {transform_indices = @transform_5, window_bounds = array<i64: 1, 8, 128>}]} {
    %c0 = arith.constant 0 : index
    %c0_0 = arith.constant 0 : index
    %c0_1 = arith.constant 0 : index
    %0 = vector.load %arg1[%c0, %c0_0, %c0_1] : memref<1x8x128xf32, #tpu.memory_space<vmem>>, vector<1x8x128xf32>
    %cst = arith.constant 0.000000e+00 : f32
    %1 = vector.broadcast %cst : f32 to vector<1x8x128xf32>
    %2 = arith.maximumf %0, %1 : vector<1x8x128xf32>
    %cst_2 = arith.constant 0.000000e+00 : f32
    %3 = vector.broadcast %cst_2 : f32 to vector<1x2x128xf32>
    %cst_3 = arith.constant 0.000000e+00 : f32
    %4 = vector.broadcast %cst_3 : f32 to vector<1x6x128xf32>
    %5 = tpu.concatenate %3, %2, %4 in 1 : vector<1x2x128xf32>, vector<1x8x128xf32>, vector<1x6x128xf32> -> vector<1x16x128xf32>
    %cst_4 = arith.constant 0.000000e+00 : f32
    %6 = vector.broadcast %cst_4 : f32 to vector<8x128xf32>
    %7 = vector.extract_strided_slice %5 {offsets = [0, 0, 0], sizes = [1, 8, 128], strides = [1, 1, 1]} : vector<1x16x128xf32> to vector<1x8x128xf32>
    %8 = vector.shape_cast %7 : vector<1x8x128xf32> to vector<8x128xf32>
    %c0_5 = arith.constant 0 : index
    %c0_6 = arith.constant 0 : index
    %c0_7 = arith.constant 0 : index
    %9 = vector.load %arg2[%c0_5, %c0_6, %c0_7] : memref<5x128x128xf32, #tpu.memory_space<vmem>>, vector<1x128x128xf32>
    %10 = vector.shape_cast %9 : vector<1x128x128xf32> to vector<128x128xf32>
    %cst_8 = arith.constant dense<0.000000e+00> : vector<8x128xf32>
    %11 = tpu.matmul %8, %10, %cst_8 {dimension_numbers = #tpu.dot_dimension_numbers<[1], [0], [0], [1], [0, 0, 1, 1], [], []>} : vector<8x128xf32>, vector<128x128xf32>, vector<8x128xf32> -> vector<8x128xf32>
    %12 = arith.addf %6, %11 : vector<8x128xf32>
    %13 = vector.extract_strided_slice %5 {offsets = [0, 1, 0], sizes = [1, 8, 128], strides = [1, 1, 1]} : vector<1x16x128xf32> to vector<1x8x128xf32>
    %14 = vector.shape_cast %13 : vector<1x8x128xf32> to vector<8x128xf32>
    %c1 = arith.constant 1 : index
    %c0_9 = arith.constant 0 : index
    %c0_10 = arith.constant 0 : index
    %15 = vector.load %arg2[%c1, %c0_9, %c0_10] : memref<5x128x128xf32, #tpu.memory_space<vmem>>, vector<1x128x128xf32>
    %16 = vector.shape_cast %15 : vector<1x128x128xf32> to vector<128x128xf32>
    %cst_11 = arith.constant dense<0.000000e+00> : vector<8x128xf32>
    %17 = tpu.matmul %14, %16, %cst_11 {dimension_numbers = #tpu.dot_dimension_numbers<[1], [0], [0], [1], [0, 0, 1, 1], [], []>} : vector<8x128xf32>, vector<128x128xf32>, vector<8x128xf32> -> vector<8x128xf32>
    %18 = arith.addf %12, %17 : vector<8x128xf32>
    %19 = vector.extract_strided_slice %5 {offsets = [0, 2, 0], sizes = [1, 8, 128], strides = [1, 1, 1]} : vector<1x16x128xf32> to vector<1x8x128xf32>
    %20 = vector.shape_cast %19 : vector<1x8x128xf32> to vector<8x128xf32>
    %c2 = arith.constant 2 : index
    %c0_12 = arith.constant 0 : index
    %c0_13 = arith.constant 0 : index
    %21 = vector.load %arg2[%c2, %c0_12, %c0_13] : memref<5x128x128xf32, #tpu.memory_space<vmem>>, vector<1x128x128xf32>
    %22 = vector.shape_cast %21 : vector<1x128x128xf32> to vector<128x128xf32>
    %cst_14 = arith.constant dense<0.000000e+00> : vector<8x128xf32>
    %23 = tpu.matmul %20, %22, %cst_14 {dimension_numbers = #tpu.dot_dimension_numbers<[1], [0], [0], [1], [0, 0, 1, 1], [], []>} : vector<8x128xf32>, vector<128x128xf32>, vector<8x128xf32> -> vector<8x128xf32>
    %24 = arith.addf %18, %23 : vector<8x128xf32>
    %25 = vector.extract_strided_slice %5 {offsets = [0, 3, 0], sizes = [1, 8, 128], strides = [1, 1, 1]} : vector<1x16x128xf32> to vector<1x8x128xf32>
    %26 = vector.shape_cast %25 : vector<1x8x128xf32> to vector<8x128xf32>
    %c3 = arith.constant 3 : index
    %c0_15 = arith.constant 0 : index
    %c0_16 = arith.constant 0 : index
    %27 = vector.load %arg2[%c3, %c0_15, %c0_16] : memref<5x128x128xf32, #tpu.memory_space<vmem>>, vector<1x128x128xf32>
    %28 = vector.shape_cast %27 : vector<1x128x128xf32> to vector<128x128xf32>
    %cst_17 = arith.constant dense<0.000000e+00> : vector<8x128xf32>
    %29 = tpu.matmul %26, %28, %cst_17 {dimension_numbers = #tpu.dot_dimension_numbers<[1], [0], [0], [1], [0, 0, 1, 1], [], []>} : vector<8x128xf32>, vector<128x128xf32>, vector<8x128xf32> -> vector<8x128xf32>
    %30 = arith.addf %24, %29 : vector<8x128xf32>
    %31 = vector.extract_strided_slice %5 {offsets = [0, 4, 0], sizes = [1, 8, 128], strides = [1, 1, 1]} : vector<1x16x128xf32> to vector<1x8x128xf32>
    %32 = vector.shape_cast %31 : vector<1x8x128xf32> to vector<8x128xf32>
    %c4 = arith.constant 4 : index
    %c0_18 = arith.constant 0 : index
    %c0_19 = arith.constant 0 : index
    %33 = vector.load %arg2[%c4, %c0_18, %c0_19] : memref<5x128x128xf32, #tpu.memory_space<vmem>>, vector<1x128x128xf32>
    %34 = vector.shape_cast %33 : vector<1x128x128xf32> to vector<128x128xf32>
    %cst_20 = arith.constant dense<0.000000e+00> : vector<8x128xf32>
    %35 = tpu.matmul %32, %34, %cst_20 {dimension_numbers = #tpu.dot_dimension_numbers<[1], [0], [0], [1], [0, 0, 1, 1], [], []>} : vector<8x128xf32>, vector<128x128xf32>, vector<8x128xf32> -> vector<8x128xf32>
    %36 = arith.addf %30, %35 : vector<8x128xf32>
    %c0_21 = arith.constant 0 : index
    %c0_22 = arith.constant 0 : index
    %37 = vector.load %arg3[%c0_21, %c0_22] : memref<1x128xf32, #tpu.memory_space<vmem>>, vector<1x128xf32>
    %38 = vector.broadcast %37 : vector<1x128xf32> to vector<8x128xf32>
    %39 = arith.addf %36, %38 : vector<8x128xf32>
    %40 = vector.shape_cast %39 : vector<8x128xf32> to vector<1x8x128xf32>
    %cst_23 = arith.constant 0.000000e+00 : f32
    %41 = vector.broadcast %cst_23 : f32 to vector<1x8x128xf32>
    %42 = arith.maximumf %40, %41 : vector<1x8x128xf32>
    %cst_24 = arith.constant 0.000000e+00 : f32
    %43 = vector.broadcast %cst_24 : f32 to vector<1x2x128xf32>
    %cst_25 = arith.constant 0.000000e+00 : f32
    %44 = vector.broadcast %cst_25 : f32 to vector<1x6x128xf32>
    %45 = tpu.concatenate %43, %42, %44 in 1 : vector<1x2x128xf32>, vector<1x8x128xf32>, vector<1x6x128xf32> -> vector<1x16x128xf32>
    %cst_26 = arith.constant 0.000000e+00 : f32
    %46 = vector.broadcast %cst_26 : f32 to vector<8x128xf32>
    %47 = vector.extract_strided_slice %45 {offsets = [0, 0, 0], sizes = [1, 8, 128], strides = [1, 1, 1]} : vector<1x16x128xf32> to vector<1x8x128xf32>
    %48 = vector.shape_cast %47 : vector<1x8x128xf32> to vector<8x128xf32>
    %c0_27 = arith.constant 0 : index
    %c0_28 = arith.constant 0 : index
    %c0_29 = arith.constant 0 : index
    %49 = vector.load %arg4[%c0_27, %c0_28, %c0_29] : memref<5x128x128xf32, #tpu.memory_space<vmem>>, vector<1x128x128xf32>
    %50 = vector.shape_cast %49 : vector<1x128x128xf32> to vector<128x128xf32>
    %cst_30 = arith.constant dense<0.000000e+00> : vector<8x128xf32>
    %51 = tpu.matmul %48, %50, %cst_30 {dimension_numbers = #tpu.dot_dimension_numbers<[1], [0], [0], [1], [0, 0, 1, 1], [], []>} : vector<8x128xf32>, vector<128x128xf32>, vector<8x128xf32> -> vector<8x128xf32>
    %52 = arith.addf %46, %51 : vector<8x128xf32>
    %53 = vector.extract_strided_slice %45 {offsets = [0, 1, 0], sizes = [1, 8, 128], strides = [1, 1, 1]} : vector<1x16x128xf32> to vector<1x8x128xf32>
    %54 = vector.shape_cast %53 : vector<1x8x128xf32> to vector<8x128xf32>
    %c1_31 = arith.constant 1 : index
    %c0_32 = arith.constant 0 : index
    %c0_33 = arith.constant 0 : index
    %55 = vector.load %arg4[%c1_31, %c0_32, %c0_33] : memref<5x128x128xf32, #tpu.memory_space<vmem>>, vector<1x128x128xf32>
    %56 = vector.shape_cast %55 : vector<1x128x128xf32> to vector<128x128xf32>
    %cst_34 = arith.constant dense<0.000000e+00> : vector<8x128xf32>
    %57 = tpu.matmul %54, %56, %cst_34 {dimension_numbers = #tpu.dot_dimension_numbers<[1], [0], [0], [1], [0, 0, 1, 1], [], []>} : vector<8x128xf32>, vector<128x128xf32>, vector<8x128xf32> -> vector<8x128xf32>
    %58 = arith.addf %52, %57 : vector<8x128xf32>
    %59 = vector.extract_strided_slice %45 {offsets = [0, 2, 0], sizes = [1, 8, 128], strides = [1, 1, 1]} : vector<1x16x128xf32> to vector<1x8x128xf32>
    %60 = vector.shape_cast %59 : vector<1x8x128xf32> to vector<8x128xf32>
    %c2_35 = arith.constant 2 : index
    %c0_36 = arith.constant 0 : index
    %c0_37 = arith.constant 0 : index
    %61 = vector.load %arg4[%c2_35, %c0_36, %c0_37] : memref<5x128x128xf32, #tpu.memory_space<vmem>>, vector<1x128x128xf32>
    %62 = vector.shape_cast %61 : vector<1x128x128xf32> to vector<128x128xf32>
    %cst_38 = arith.constant dense<0.000000e+00> : vector<8x128xf32>
    %63 = tpu.matmul %60, %62, %cst_38 {dimension_numbers = #tpu.dot_dimension_numbers<[1], [0], [0], [1], [0, 0, 1, 1], [], []>} : vector<8x128xf32>, vector<128x128xf32>, vector<8x128xf32> -> vector<8x128xf32>
    %64 = arith.addf %58, %63 : vector<8x128xf32>
    %65 = vector.extract_strided_slice %45 {offsets = [0, 3, 0], sizes = [1, 8, 128], strides = [1, 1, 1]} : vector<1x16x128xf32> to vector<1x8x128xf32>
    %66 = vector.shape_cast %65 : vector<1x8x128xf32> to vector<8x128xf32>
    %c3_39 = arith.constant 3 : index
    %c0_40 = arith.constant 0 : index
    %c0_41 = arith.constant 0 : index
    %67 = vector.load %arg4[%c3_39, %c0_40, %c0_41] : memref<5x128x128xf32, #tpu.memory_space<vmem>>, vector<1x128x128xf32>
    %68 = vector.shape_cast %67 : vector<1x128x128xf32> to vector<128x128xf32>
    %cst_42 = arith.constant dense<0.000000e+00> : vector<8x128xf32>
    %69 = tpu.matmul %66, %68, %cst_42 {dimension_numbers = #tpu.dot_dimension_numbers<[1], [0], [0], [1], [0, 0, 1, 1], [], []>} : vector<8x128xf32>, vector<128x128xf32>, vector<8x128xf32> -> vector<8x128xf32>
    %70 = arith.addf %64, %69 : vector<8x128xf32>
    %71 = vector.extract_strided_slice %45 {offsets = [0, 4, 0], sizes = [1, 8, 128], strides = [1, 1, 1]} : vector<1x16x128xf32> to vector<1x8x128xf32>
    %72 = vector.shape_cast %71 : vector<1x8x128xf32> to vector<8x128xf32>
    %c4_43 = arith.constant 4 : index
    %c0_44 = arith.constant 0 : index
    %c0_45 = arith.constant 0 : index
    %73 = vector.load %arg4[%c4_43, %c0_44, %c0_45] : memref<5x128x128xf32, #tpu.memory_space<vmem>>, vector<1x128x128xf32>
    %74 = vector.shape_cast %73 : vector<1x128x128xf32> to vector<128x128xf32>
    %cst_46 = arith.constant dense<0.000000e+00> : vector<8x128xf32>
    %75 = tpu.matmul %72, %74, %cst_46 {dimension_numbers = #tpu.dot_dimension_numbers<[1], [0], [0], [1], [0, 0, 1, 1], [], []>} : vector<8x128xf32>, vector<128x128xf32>, vector<8x128xf32> -> vector<8x128xf32>
    %76 = arith.addf %70, %75 : vector<8x128xf32>
    %c0_47 = arith.constant 0 : index
    %c0_48 = arith.constant 0 : index
    %77 = vector.load %arg5[%c0_47, %c0_48] : memref<1x128xf32, #tpu.memory_space<vmem>>, vector<1x128xf32>
    %78 = vector.broadcast %77 : vector<1x128xf32> to vector<8x128xf32>
    %79 = arith.addf %76, %78 : vector<8x128xf32>
    %80 = vector.shape_cast %79 : vector<8x128xf32> to vector<1x8x128xf32>
    %81 = arith.addf %0, %80 : vector<1x8x128xf32>
    %c0_49 = arith.constant 0 : index
    %c0_50 = arith.constant 0 : index
    %c0_51 = arith.constant 0 : index
    %82 = vector.load %arg6[%c0_49, %c0_50, %c0_51] : memref<1x8x128xf32, #tpu.memory_space<vmem>>, vector<1x8x128xf32>
    tpu.vector_store %arg6[%c0_49, %c0_50, %c0_51], %81 {strides = array<i32>} : memref<1x8x128xf32, #tpu.memory_space<vmem>>, vector<1x8x128xf32>,
    return
  }
  func.func @transform_0(%arg0: i32) -> (i32, i32, i32) {
    %c0_i32 = arith.constant 0 : i32
    %c0_i32_0 = arith.constant 0 : i32
    %c0_i32_1 = arith.constant 0 : i32
    return %arg0, %c0_i32, %c0_i32_0 : i32, i32, i32
  }
  func.func @transform_1(%arg0: i32) -> (i32, i32, i32) {
    %c0_i32 = arith.constant 0 : i32
    %c0_i32_0 = arith.constant 0 : i32
    %c0_i32_1 = arith.constant 0 : i32
    %c0_i32_2 = arith.constant 0 : i32
    return %c0_i32, %c0_i32_0, %c0_i32_1 : i32, i32, i32
  }
  func.func @transform_2(%arg0: i32) -> (i32, i32) {
    %c0_i32 = arith.constant 0 : i32
    %c0_i32_0 = arith.constant 0 : i32
    %c0_i32_1 = arith.constant 0 : i32
    return %c0_i32, %c0_i32_0 : i32, i32
  }
  func.func @transform_3(%arg0: i32) -> (i32, i32, i32) {
    %c0_i32 = arith.constant 0 : i32
    %c0_i32_0 = arith.constant 0 : i32
    %c0_i32_1 = arith.constant 0 : i32
    %c0_i32_2 = arith.constant 0 : i32
    return %c0_i32, %c0_i32_0, %c0_i32_1 : i32, i32, i32
  }
  func.func @transform_4(%arg0: i32) -> (i32, i32) {
    %c0_i32 = arith.constant 0 : i32
    %c0_i32_0 = arith.constant 0 : i32
    %c0_i32_1 = arith.constant 0 : i32
    return %c0_i32, %c0_i32_0 : i32, i32
  }
  func.func @transform_5(%arg0: i32) -> (i32, i32, i32) {
    %c0_i32 = arith.constant 0 : i32
    %c0_i32_0 = arith.constant 0 : i32
    %c0_i32_1 = arith.constant 0 : i32
    return %arg0, %c0_i32, %c0_i32_0 : i32, i32, i32
  }
}

</mosaic_0001>

<bundles_post_ra>
// kernel: tpu_custom_call.1
= control target key start
LH: loop header
LB: loop body
LE: loop exit
PB: predicated region body
PF: predicated region fallthrough
CT: control target
= control target key end

     0   :  { %10 = vsyncpa [#allocation3], 0  ;;  %s2150_s0 = inlined_call_operand.hbm [shape: f32[1,8,128], index: 0, kind: input, shape index: {}]   ;;  %s2151_s1 = inlined_call_operand.hbm [shape: f32[5,128,128], index: 1, kind: input, shape index: {}]   ;;  %s2152_s2 = inlined_call_operand.vmem [shape: f32[1,128], index: 2, kind: input, shape index: {}]   ;;  %s2153_s3 = inlined_call_operand.hbm [shape: f32[5,128,128], index: 3, kind: input, shape index: {}]   ;;  %s2154_s4 = inlined_call_operand.vmem [shape: f32[1,128], index: 4, kind: input, shape index: {}]   ;;  %s2155_s5 = inlined_call_operand.hbm [shape: f32[1,8,128], index: 5, kind: output, shape index: {}]  }
   0x1   :  { %11 = vsyncpa [#allocation6], 0 }
   0x2   :  { %12 = vsyncpa [#allocation4], 0  ;;  %s1891_s18 = smov [#allocation5]   ;;  %s1797_s22 = scalar_lea.hbm %s2151_s1, 10240 }
   0x3   :  { %s28_s19 = sshll.u32 %s1891_s18, 4  ;;  %p1798_p0 = scmp.ne.s32.totalorder %s2151_s1, %s1797_s22  ;;  %s29_s19 = int_to_ptr.vmem [resolvable:$true] %s28_s19 }
   0x4   :  { %p1801_p1 = scmp.lt.u32.totalorder %s1797_s22, %s2151_s1 }
   0x6   :  { %p1803_p2 = pnand %p1801_p1, %p1798_p0 }
   0x8   :  { %1806 = shalt.err (!%p1803_p2)
}
   0x9   :  { %s1807_s27 = scalar_lea.vmem %s29_s19, 10240  ;;  %p1812_p4 = scmp.lt.s32.totalorder %s29_s19, %s29_s19 }
   0xa   :  { %p1808_p3 = scmp.ne.s32.totalorder %s29_s19, %s1807_s27  ;;  %p1813_p5 = scmp.lt.s32.totalorder %s1807_s27, %s1807_s27 }
   0xc   :  { %p1814_p6 = por %p1813_p5, %p1812_p4 }
   0xe   :  { %p1815_p7 = pnand %p1814_p6, %p1808_p3 }
  0x10   :  { %1818 = shalt.err (!%p1815_p7)
}
  0x11   :  { %s1892_s28 = smov 128   ;;  %s1893_s29 = smov 8  }
  0x12   :  { %34 = dma.hbm_to_vmem [thread:$0]  %s2151_s1, 10240, %s29_s19, [#allocation6], %s1892_s28, %s1892_s28, %s1893_s29  }
  0x13   :  { %s1894_s7 = smov [#allocation2]   ;;  %s1895_s9 = smov [#allocation7]  }
  0x14   :  { %s19_s8 = sshll.u32 %s1894_s7, 4  ;;  %s42_s10 = sshll.u32 %s1895_s9, 4  ;;  %s20_s8 = int_to_ptr.vmem [resolvable:$true] %s19_s8  ;;  %s43_s10 = int_to_ptr.vmem [resolvable:$true] %s42_s10 }
  0x15   :  { %s1819_s13 = scalar_lea.hbm %s2150_s0, 128 }
  0x16   :  { %p1820_p8 = scmp.ne.s32.totalorder %s2150_s0, %s1819_s13  ;;  %p1823_p9 = scmp.lt.u32.totalorder %s1819_s13, %s2150_s0 }
  0x18   :  { %p1825_p10 = pnand %p1823_p9, %p1820_p8 }
  0x1a   :  { %1828 = shalt.err (!%p1825_p10)
}
  0x1b   :  { %s1829_s1 = scalar_lea.vmem %s20_s8, 128  ;;  %p1834_p12 = scmp.lt.s32.totalorder %s20_s8, %s20_s8 }
  0x1c   :  { %p1830_p11 = scmp.ne.s32.totalorder %s20_s8, %s1829_s1  ;;  %p1835_p13 = scmp.lt.s32.totalorder %s1829_s1, %s1829_s1 }
  0x1e   :  { %p1836_p0 = por %p1835_p13, %p1834_p12 }
  0x20   :  { %p1837_p1 = pnand %p1836_p0, %p1830_p11 }
  0x22   :  { %1840 = shalt.err (!%p1837_p1)
}
  0x23   :  { %22 = dma.hbm_to_vmem [thread:$0]  %s2150_s0, 128, %s20_s8, [#allocation3]  }
  0x24   :  { %s1841_s22 = scalar_lea.hbm %s2153_s3, 10240 }
  0x25   :  { %p1842_p2 = scmp.ne.s32.totalorder %s2153_s3, %s1841_s22  ;;  %p1845_p3 = scmp.lt.u32.totalorder %s1841_s22, %s2153_s3 }
  0x27   :  { %p1847_p4 = pnand %p1845_p3, %p1842_p2 }
  0x29   :  { %1850 = shalt.err (!%p1847_p4)
}
  0x2a   :  { %s1851_s27 = scalar_lea.vmem %s43_s10, 10240  ;;  %p1856_p6 = scmp.lt.s32.totalorder %s43_s10, %s43_s10 }
  0x2b   :  { %p1852_p5 = scmp.ne.s32.totalorder %s43_s10, %s1851_s27  ;;  %p1857_p7 = scmp.lt.s32.totalorder %s1851_s27, %s1851_s27 }
  0x2d   :  { %p1858_p8 = por %p1857_p7, %p1856_p6 }
  0x2f   :  { %p1859_p9 = pnand %p1858_p8, %p1852_p5 }
  0x31   :  { %1862 = shalt.err (!%p1859_p9)
}
  0x32   :  { %48 = dma.hbm_to_vmem [thread:$0]  %s2153_s3, 10240, %s43_s10, [#allocation6], %s1892_s28, %s1892_s28, %s1893_s29  }
  0x33   :  { %1885 = dma.done.wait [#allocation3], 128  }
  0x34   :  { %1886 = vsyncadd [#allocation3], 4294967168 }
  0x35   :  { %1887 = dma.done.wait [#allocation6], 20480  }
  0x36   :  { %1888 = vsyncadd [#allocation6], 4294946816  ;;  %v1896_v0 = vmov 0.0|0.0   ;;  %vm1897_vm0 = vmmov 0   ;;  %v1898_v1 = vmov 0.0   ;;  %v85_v2 = vld [vmem:[#allocation5 + $0x80] sm:$0xff] }
  0x37   :  { %1548 = vmatprep.subr.bf16.mxu0 %v1896_v0  ;;  %1572 = vmatprep.subr.bf16.mxu1 %v1896_v0  ;;  %v86_v3 = vld [vmem:[#allocation5 + $0x88] sm:$0xff]  ;;  %v68_v4 = vld [vmem:[#allocation5] sm:$0xff]  ;;  %v87_v7 = vld [vmem:[#allocation5 + $0x90] sm:$0xff]  ;;  %vm65_vm1 = vcmask 1041408   ;;  %vm451_vm2 = vcmask 1043456   ;;  %vm103_vm3 = vcmask 1046528  }
  0x38   :  { %1230 = vmatprep.mubr.msk.f32.mxu0 %vm1897_vm0, %v1898_v1  ;;  %1265 = vmatprep.mubr.msk.f32.mxu1 %vm1897_vm0, %v1898_v1  ;;  %v1549_v5 = vpack.c.bf16 %v86_v3, %v85_v2  ;;  %v69_v6 = vld [vmem:[#allocation5 + $0x8] sm:$0xff]  ;;  %v88_v8 = vld [vmem:[#allocation5 + $0x98] sm:$0xff]  ;;  %v70_v10 = vld [vmem:[#allocation5 + $0x10] sm:$0xff]  ;;  %vm265_vm5 = vcmask 1045504   ;;  %vm358_vm6 = vcmask 1044480   ;;  %s1899_s6 = smov [#allocation8]  }
  0x39   :  { %v1573_v9 = vpack.c.bf16 %v69_v6, %v68_v4  ;;  %v71_v11 = vld [vmem:[#allocation5 + $0x18] sm:$0xff]  ;;  %v1552_v12 = vpack.c.bf16 %v88_v8, %v87_v7  ;;  %v89_v14 = vld [vmem:[#allocation5 + $0xa0] sm:$0xff]  ;;  %v90_v15 = vld [vmem:[#allocation5 + $0xa8] sm:$0xff]  ;;  %s1012_s7 = sshll.u32 %s1899_s6, 4  ;;  %s1013_s7 = int_to_ptr.vmem [resolvable:$true] %s1012_s7 }
  0x3a   :  { %1550 = vmatpush3.bf16.msra.mxu0 %v1549_v5  ;;  %v1576_v13 = vpack.c.bf16 %v71_v11, %v70_v10  ;;  %v72_v16 = vld [vmem:[#allocation5 + $0x20] sm:$0xff]  ;;  %v73_v17 = vld [vmem:[#allocation5 + $0x28] sm:$0xff]  ;;  %v1555_v18 = vpack.c.bf16 %v90_v15, %v89_v14  ;;  %v91_v20 = vld [vmem:[#allocation5 + $0xb0] sm:$0xff]  ;;  %s1863_s8 = scalar_lea.vmem %s1013_s7, 128  ;;  %p1868_p11 = scmp.lt.s32.totalorder %s1013_s7, %s1013_s7 }
  0x3b   :  { %1574 = vmatpush3.bf16.msra.mxu1 %v1573_v9  ;;  %1551 = vmatprep.subr.bf16.mxu0 %v1896_v0  ;;  %v1579_v19 = vpack.c.bf16 %v73_v17, %v72_v16  ;;  %v92_v21 = vld [vmem:[#allocation5 + $0xb8] sm:$0xff]  ;;  %v74_v22 = vld [vmem:[#allocation5 + $0x30] sm:$0xff]  ;;  %v93_v28 = vld [vmem:[#allocation5 + $0xc0] sm:$0xff]  ;;  %p1864_p10 = scmp.ne.s32.totalorder %s1013_s7, %s1863_s8  ;;  %p1869_p12 = scmp.lt.s32.totalorder %s1863_s8, %s1863_s8 }
  0x3c   :  { %1575 = vmatprep.subr.bf16.mxu1 %v1896_v0  ;;  %v75_v23 = vld [vmem:[#allocation5 + $0x38] sm:$0xff]  ;;  %v1558_v25 = vpack.c.bf16 %v92_v21, %v91_v20  ;;  %v94_v29 = vld [vmem:[#allocation5 + $0xc8] sm:$0xff]  ;;  %v76_v30 = vld [vmem:[#allocation5 + $0x40] sm:$0xff] }
  0x3d   :  { %v1982_v24 = vld [vmem:[#allocation2] sm:$0xff]  ;;  %v1582_v27 = vpack.c.bf16 %v75_v23, %v74_v22  ;;  %v77_v31 = vld [vmem:[#allocation5 + $0x48] sm:$0xff]  ;;  %v1561_v33 = vpack.c.bf16 %v94_v29, %v93_v28  ;;  %v95_v35 = vld [vmem:[#allocation5 + $0xd0] sm:$0xff]  ;;  %p1870_p13 = por %p1869_p12, %p1868_p11 }
  0x3e   :  { %1553 = vmatpush3.bf16.msra.mxu0 %v1552_v12  ;;  %v61_v26 = vmax.f32 %v1982_v24, 0.0  ;;  %v1585_v34 = vpack.c.bf16 %v77_v31, %v76_v30  ;;  %v96_v36 = vld [vmem:[#allocation5 + $0xd8] sm:$0xff]  ;;  %v78_v37 = vld [vmem:[#allocation5 + $0x50] sm:$0xff]  ;;  %v97_v45 = vld [vmem:[#allocation5 + $0xe0] sm:$0xff] }
  0x3f   :  { %1577 = vmatpush3.bf16.msra.mxu1 %v1576_v13  ;;  %1554 = vmatprep.subr.bf16.mxu0 %v1896_v0  ;;  %v79_v38 = vld [vmem:[#allocation5 + $0x58] sm:$0xff]  ;;  %v1564_v42 = vpack.c.bf16 %v96_v36, %v95_v35  ;;  %v98_v46 = vld [vmem:[#allocation5 + $0xe8] sm:$0xff]  ;;  %v80_v47 = vld [vmem:[#allocation5 + $0x60] sm:$0xff]  ;;  %p1871_p0 = pnand %p1870_p13, %p1864_p10 }
  0x40   :  { %1578 = vmatprep.subr.bf16.mxu1 %v1896_v0  ;;  %v1987_v32 = vrot.slane %v61_v26, 6  ;;  %v1588_v44 = vpack.c.bf16 %v79_v38, %v78_v37  ;;  %v81_v48 = vld [vmem:[#allocation5 + $0x68] sm:$0xff]  ;;  %v1567_v50 = vpack.c.bf16 %v98_v46, %v97_v45  ;;  %v99_v52 = vld [vmem:[#allocation5 + $0xf0] sm:$0xff]  ;;  %v100_v53 = vld [vmem:[#allocation5 + $0xf8] sm:$0xff] }
  0x41   :  { %v1591_v51 = vpack.c.bf16 %v81_v48, %v80_v47  ;;  %v82_v54 = vld [vmem:[#allocation5 + $0x70] sm:$0xff]  ;;  %v83_v55 = vld [vmem:[#allocation5 + $0x78] sm:$0xff]  ;;  %v1570_v56 = vpack.c.bf16 %v100_v53, %v99_v52  ;;  %v249_v60 = vld [vmem:[#allocation5 + $0x100] sm:$0xff] }
  0x42   :  { %1556 = vmatpush3.bf16.msra.mxu0 %v1555_v18  ;;  %v1993_v39 = vsel %vm65_vm1, 0.0, %v1987_v32  ;;  %v1997_v40 = vsel %vm65_vm1, %v1987_v32, 0.0  ;;  %v1594_v59 = vpack.c.bf16 %v83_v55, %v82_v54  ;;  %v250_v61 = vld [vmem:[#allocation5 + $0x108] sm:$0xff]  ;;  %v342_v62 = vld [vmem:[#allocation5 + $0x180] sm:$0xff]  ;;  %vm2015_vm4 = vmneg %vm65_vm1 }
  0x43   :  { %1580 = vmatpush3.bf16.msra.mxu1 %v1579_v19  ;;  %1557 = vmatprep.subr.bf16.mxu0 %v1896_v0  ;;  %v452_v41 = vrot.slane %v1993_v39, 4  ;;  %v453_v43 = vrot.slane %v1997_v40, 4  ;;  %v104_v57 = vrot.slane %v1993_v39, 1  ;;  %v105_v58 = vrot.slane %v1997_v40, 1  ;;  %v343_v63 = vld [vmem:[#allocation5 + $0x188] sm:$0xff]  ;;  %v251_v6 = vld [vmem:[#allocation5 + $0x110] sm:$0xff] }
  0x44   :  { %1581 = vmatprep.subr.bf16.mxu1 %v1896_v0  ;;  %v1597_v3 = vpack.c.bf16 %v250_v61, %v249_v60  ;;  %v1621_v5 = vpack.c.bf16 %v343_v63, %v342_v62  ;;  %v252_v7 = vld [vmem:[#allocation5 + $0x118] sm:$0xff]  ;;  %v344_v8 = vld [vmem:[#allocation5 + $0x190] sm:$0xff]  ;;  %v253_v12 = vld [vmem:[#allocation5 + $0x120] sm:$0xff]  ;;  %v267_v52 = vrot.slane %v1997_v40, 2 }
  0x45   :  { %v2004_v49 = vsel %vm451_vm2, %v452_v41, %v453_v43  ;;  %v106_v2 = vsel %vm103_vm3, %v104_v57, %v105_v58  ;;  %v345_v9 = vld [vmem:[#allocation5 + $0x198] sm:$0xff]  ;;  %v1600_v10 = vpack.c.bf16 %v252_v7, %v251_v6  ;;  %v254_v13 = vld [vmem:[#allocation5 + $0x128] sm:$0xff]  ;;  %v346_v14 = vld [vmem:[#allocation5 + $0x1a0] sm:$0xff]  ;;  %v360_v57 = vrot.slane %v1997_v40, 3 }
  0x46   :  { %1559 = vmatpush3.bf16.msra.mxu0 %v1558_v25  ;;  %v1624_v11 = vpack.c.bf16 %v345_v9, %v344_v8  ;;  %v347_v15 = vld [vmem:[#allocation5 + $0x1a8] sm:$0xff]  ;;  %v1603_v16 = vpack.c.bf16 %v254_v13, %v253_v12  ;;  %v255_v18 = vld [vmem:[#allocation5 + $0x130] sm:$0xff]  ;;  %v256_v19 = vld [vmem:[#allocation5 + $0x138] sm:$0xff] }
  0x47   :  { %1583 = vmatpush3.bf16.msra.mxu1 %v1582_v27  ;;  %1560 = vmatprep.subr.bf16.mxu0 %v1896_v0  ;;  %v1627_v17 = vpack.c.bf16 %v347_v15, %v346_v14  ;;  %v348_v20 = vld [vmem:[#allocation5 + $0x1b0] sm:$0xff]  ;;  %v349_v21 = vld [vmem:[#allocation5 + $0x1b8] sm:$0xff]  ;;  %v1606_v22 = vpack.c.bf16 %v256_v19, %v255_v18  ;;  %v257_v25 = vld [vmem:[#allocation5 + $0x140] sm:$0xff] }
  0x48   :  { %1584 = vmatprep.subr.bf16.mxu1 %v1896_v0  ;;  %v1630_v23 = vpack.c.bf16 %v349_v21, %v348_v20  ;;  %v258_v26 = vld [vmem:[#allocation5 + $0x148] sm:$0xff]  ;;  %v350_v27 = vld [vmem:[#allocation5 + $0x1c0] sm:$0xff]  ;;  %v259_v31 = vld [vmem:[#allocation5 + $0x150] sm:$0xff] }
  0x49   :  { %v351_v28 = vld [vmem:[#allocation5 + $0x1c8] sm:$0xff]  ;;  %v1609_v29 = vpack.c.bf16 %v258_v26, %v257_v25  ;;  %v261_v37 = vld [vmem:[#allocation5 + $0x160] sm:$0xff]  ;;  %v263_v45 = vld [vmem:[#allocation5 + $0x170] sm:$0xff] }
  0x4a   :  { %1562 = vmatpush3.bf16.msra.mxu0 %v1561_v33  ;;  %v1633_v30 = vpack.c.bf16 %v351_v28, %v350_v27  ;;  %v352_v33 = vld [vmem:[#allocation5 + $0x1d0] sm:$0xff]  ;;  %v262_v38 = vld [vmem:[#allocation5 + $0x168] sm:$0xff]  ;;  %v354_v41 = vld [vmem:[#allocation5 + $0x1e0] sm:$0xff] }
  0x4b   :  { %1586 = vmatpush3.bf16.msra.mxu1 %v1585_v34  ;;  %1563 = vmatprep.subr.bf16.mxu0 %v1896_v0  ;;  %v353_v34 = vld [vmem:[#allocation5 + $0x1d8] sm:$0xff]  ;;  %v1615_v43 = vpack.c.bf16 %v262_v38, %v261_v37  ;;  %v356_v47 = vld [vmem:[#allocation5 + $0x1f0] sm:$0xff]  ;;  %v435_v54 = vld [vmem:[#allocation5 + $0x200] sm:$0xff] }
  0x4c   :  { %1587 = vmatprep.subr.bf16.mxu1 %v1896_v0  ;;  %v1636_v36 = vpack.c.bf16 %v353_v34, %v352_v33  ;;  %v264_v46 = vld [vmem:[#allocation5 + $0x178] sm:$0xff]  ;;  %v436_v55 = vld [vmem:[#allocation5 + $0x208] sm:$0xff]  ;;  %v437_v61 = vld [vmem:[#allocation5 + $0x210] sm:$0xff] }
  0x4d   :  { %v357_v48 = vld [vmem:[#allocation5 + $0x1f8] sm:$0xff]  ;;  %v439_v40 = vld [vmem:[#allocation5 + $0x220] sm:$0xff]  ;;  %v440_v63 = vld [vmem:[#allocation5 + $0x228] sm:$0xff] }
  0x4e   :  { %1565 = vmatpush3.bf16.msra.mxu0 %v1564_v42  ;;  %v355_v42 = vld [vmem:[#allocation5 + $0x1e8] sm:$0xff]  ;;  %v1642_v53 = vpack.c.bf16 %v357_v48, %v356_v47  ;;  %v438_v62 = vld [vmem:[#allocation5 + $0x218] sm:$0xff]  ;;  %v443_v7 = vld [vmem:[#allocation5 + $0x240] sm:$0xff] }
  0x4f   :  { %1589 = vmatpush3.bf16.msra.mxu1 %v1588_v44  ;;  %1566 = vmatprep.subr.bf16.mxu0 %v1896_v0  ;;  %v1639_v44 = vpack.c.bf16 %v355_v42, %v354_v41  ;;  %v444_v8 = vld [vmem:[#allocation5 + $0x248] sm:$0xff]  ;;  %v447_v13 = vld [vmem:[#allocation5 + $0x260] sm:$0xff]  ;;  %v543_v25 = vld [vmem:[#allocation7 + $0x10] sm:$0xff] }
  0x50   :  { %1590 = vmatprep.subr.bf16.mxu1 %v1896_v0  ;;  %v1657_v9 = vpack.c.bf16 %v444_v8, %v443_v7  ;;  %v448_v14 = vld [vmem:[#allocation5 + $0x268] sm:$0xff]  ;;  %v541_v19 = vld [vmem:[#allocation7] sm:$0xff]  ;;  %v544_v26 = vld [vmem:[#allocation7 + $0x18] sm:$0xff] }
  0x51   :  { %v1663_v15 = vpack.c.bf16 %v448_v14, %v447_v13  ;;  %v542_v20 = vld [vmem:[#allocation7 + $0x8] sm:$0xff]  ;;  %v558_v21 = vld [vmem:[#allocation7 + $0x80] sm:$0xff]  ;;  %v560_v28 = vld [vmem:[#allocation7 + $0x90] sm:$0xff] }
  0x52   :  { %1568 = vmatpush3.bf16.msra.mxu0 %v1567_v50  ;;  %v1618_v50 = vpack.c.bf16 %v264_v46, %v263_v45  ;;  %v562_v33 = vld [vmem:[#allocation7 + $0xa0] sm:$0xff]  ;;  %v563_v34 = vld [vmem:[#allocation7 + $0xa8] sm:$0xff]  ;;  %v547_v37 = vld [vmem:[#allocation7 + $0x30] sm:$0xff] }
  0x53   :  { %1592 = vmatpush3.bf16.msra.mxu1 %v1591_v51  ;;  %1569 = vmatprep.subr.bf16.mxu0 %v1896_v0  ;;  %v266_v51 = vrot.slane %v1993_v39, 2  ;;  %v548_v38 = vld [vmem:[#allocation7 + $0x38] sm:$0xff]  ;;  %v564_v41 = vld [vmem:[#allocation7 + $0xb0] sm:$0xff]  ;;  %v549_v45 = vld [vmem:[#allocation7 + $0x40] sm:$0xff] }
  0x54   :  { %1593 = vmatprep.subr.bf16.mxu1 %v1896_v0  ;;  %v565_v42 = vld [vmem:[#allocation7 + $0xb8] sm:$0xff]  ;;  %v550_v46 = vld [vmem:[#allocation7 + $0x48] sm:$0xff]  ;;  %v566_v47 = vld [vmem:[#allocation7 + $0xc0] sm:$0xff] }
  0x55   :  { %v268_v58 = vsel %vm265_vm5, %v266_v51, %v267_v52  ;;  %v567_v48 = vld [vmem:[#allocation7 + $0xc8] sm:$0xff]  ;;  %v551_v52 = vld [vmem:[#allocation7 + $0x50] sm:$0xff] }
  0x56   :  { %1571 = vmatpush3.bf16.msra.mxu0 %v1570_v56  ;;  %v359_v56 = vrot.slane %v1993_v39, 3  ;;  %v1648_v39 = vpack.c.bf16 %v438_v62, %v437_v61  ;;  %v1681_v51 = vpack.c.bf16 %v567_v48, %v566_v47  ;;  %v570_v61 = vld [vmem:[#allocation7 + $0xe0] sm:$0xff]  ;;  %v571_v62 = vld [vmem:[#allocation7 + $0xe8] sm:$0xff] }
  0x57   :  { %1595 = vmatpush3.bf16.msra.mxu1 %v1594_v59  ;;  %1596 = vmatprep.subr.bf16.mxu0 %v1896_v0  ;;  %v1645_v59 = vpack.c.bf16 %v436_v55, %v435_v54  ;;  %v568_v55 = vld [vmem:[#allocation7 + $0xd0] sm:$0xff] }
  0x58   :  { %1620 = vmatprep.subr.bf16.mxu1 %v1896_v0  ;;  %v361_v60 = vsel %vm358_vm6, %v359_v56, %v360_v57  ;;  %v569_v56 = vld [vmem:[#allocation7 + $0xd8] sm:$0xff]  ;;  %v553_v57 = vld [vmem:[#allocation7 + $0x60] sm:$0xff] }
  0x59   :  { %1231 = vmatmul.mubr.f32.vlgmr.msra.gmra.mrb[0].mxu0 %v106_v2  ;;  %v1651_v2 = vpack.c.bf16 %v440_v63, %v439_v40  ;;  %v1687_v40 = vpack.c.bf16 %v571_v62, %v570_v61  ;;  %v556_v63 = vld [vmem:[#allocation7 + $0x78] sm:$0xff]  ;;  %v729_v62 = vld [vmem:[#allocation7 + $0x140] sm:$0xff] }
  0x5a   :  { %1266 = vmatmul.mubr.msk.f32.vlgmr.msra.gmra.mrb[0].mxu1 %vm2015_vm4, %v1987_v32  ;;  %1598 = vmatpush3.bf16.msra.mxu0 %v1597_v3  ;;  %v260_v32 = vld [vmem:[#allocation5 + $0x158] sm:$0xff]  ;;  %v441_v3 = vld [vmem:[#allocation5 + $0x230] sm:$0xff] }
  0x5b   :  { %1622 = vmatpush3.bf16.msra.mxu1 %v1621_v5  ;;  %1599 = vmatprep.subr.bf16.mxu0 %v1896_v0  ;;  %v1612_v35 = vpack.c.bf16 %v260_v32, %v259_v31  ;;  %v442_v5 = vld [vmem:[#allocation5 + $0x238] sm:$0xff]  ;;  %v546_v32 = vld [vmem:[#allocation7 + $0x28] sm:$0xff] }
  0x5c   :  { %1623 = vmatprep.subr.bf16.mxu1 %v1896_v0  ;;  %1300 = vmatprep.mubr.msk.f32.mxu0 %vm1897_vm0, %v1898_v1  ;;  %v1654_v6 = vpack.c.bf16 %v442_v5, %v441_v3  ;;  %v572_v3 = vld [vmem:[#allocation7 + $0xf0] sm:$0xff]  ;;  %v573_v5 = vld [vmem:[#allocation7 + $0xf8] sm:$0xff] }
  0x5d   :  { %1335 = vmatprep.mubr.msk.f32.mxu1 %vm1897_vm0, %v1898_v1 }
  0x5e   :  { %1601 = vmatpush3.bf16.msra.mxu0 %v1600_v10  ;;  %v445_v10 = vld [vmem:[#allocation5 + $0x250] sm:$0xff] }
  0x5f   :  { %1625 = vmatpush3.bf16.msra.mxu1 %v1624_v11  ;;  %1602 = vmatprep.subr.bf16.mxu0 %v1896_v0  ;;  %v446_v11 = vld [vmem:[#allocation5 + $0x258] sm:$0xff] }
  0x60   :  { %1626 = vmatprep.subr.bf16.mxu1 %v1896_v0  ;;  %v1660_v12 = vpack.c.bf16 %v446_v11, %v445_v10 }
  0x62   :  { %1604 = vmatpush3.bf16.msra.mxu0 %v1603_v16  ;;  %v449_v16 = vld [vmem:[#allocation5 + $0x270] sm:$0xff] }
  0x63   :  { %1628 = vmatpush3.bf16.msra.mxu1 %v1627_v17  ;;  %1605 = vmatprep.subr.bf16.mxu0 %v1896_v0  ;;  %v450_v17 = vld [vmem:[#allocation5 + $0x278] sm:$0xff] }
  0x64   :  { %1629 = vmatprep.subr.bf16.mxu1 %v1896_v0  ;;  %v1666_v18 = vpack.c.bf16 %v450_v17, %v449_v16 }
  0x66   :  { %1607 = vmatpush3.bf16.msra.mxu0 %v1606_v22  ;;  %v1693_v22 = vpack.c.bf16 %v542_v20, %v541_v19  ;;  %v1024_v19 = vld [vmem:[%s2152_s2] ss:$0 sm:$0xff] }
  0x67   :  { %1631 = vmatpush3.bf16.msra.mxu1 %v1630_v23  ;;  %1608 = vmatprep.subr.bf16.mxu0 %v1896_v0  ;;  %v559_v23 = vld [vmem:[#allocation7 + $0x88] sm:$0xff] }
  0x68   :  { %1632 = vmatprep.subr.bf16.mxu1 %v1896_v0  ;;  %v1669_v27 = vpack.c.bf16 %v559_v23, %v558_v21  ;;  %v813_v23 = vld [vmem:[#allocation7 + $0x180] sm:$0xff] }
  0x6a   :  { %1610 = vmatpush3.bf16.msra.mxu0 %v1609_v29  ;;  %v561_v29 = vld [vmem:[#allocation7 + $0x98] sm:$0xff] }
  0x6b   :  { %1634 = vmatpush3.bf16.msra.mxu1 %v1633_v30  ;;  %1611 = vmatprep.subr.bf16.mxu0 %v1896_v0  ;;  %v1696_v30 = vpack.c.bf16 %v544_v26, %v543_v25  ;;  %v1672_v31 = vpack.c.bf16 %v561_v29, %v560_v28  ;;  %v814_v25 = vld [vmem:[#allocation7 + $0x188] sm:$0xff]  ;;  %v721_v28 = vld [vmem:[#allocation7 + $0x100] sm:$0xff] }
  0x6c   :  { %1635 = vmatprep.subr.bf16.mxu1 %v1896_v0 }
  0x6e   :  { %1613 = vmatpush3.bf16.msra.mxu0 %v1612_v35 }
  0x6f   :  { %1637 = vmatpush3.bf16.msra.mxu1 %v1636_v36  ;;  %1614 = vmatprep.subr.bf16.mxu0 %v1896_v0  ;;  %v1675_v36 = vpack.c.bf16 %v563_v34, %v562_v33 }
  0x70   :  { %1638 = vmatprep.subr.bf16.mxu1 %v1896_v0 }
  0x72   :  { %1616 = vmatpush3.bf16.msra.mxu0 %v1615_v43  ;;  %v1702_v43 = vpack.c.bf16 %v548_v38, %v547_v37  ;;  %v723_v38 = vld [vmem:[#allocation7 + $0x110] sm:$0xff] }
  0x73   :  { %1640 = vmatpush3.bf16.msra.mxu1 %v1639_v44  ;;  %1617 = vmatprep.subr.bf16.mxu0 %v1896_v0  ;;  %v1678_v44 = vpack.c.bf16 %v565_v42, %v564_v41  ;;  %v724_v41 = vld [vmem:[#allocation7 + $0x118] sm:$0xff]  ;;  %v817_v42 = vld [vmem:[#allocation7 + $0x1a0] sm:$0xff] }
  0x74   :  { %1641 = vmatprep.subr.bf16.mxu1 %v1896_v0  ;;  %v1720_v47 = vpack.c.bf16 %v724_v41, %v723_v38  ;;  %v913_v38 = vld [vmem:[#allocation7 + $0x240] sm:$0xff]  ;;  %v914_v41 = vld [vmem:[#allocation7 + $0x248] sm:$0xff] }
  0x76   :  { %1619 = vmatpush3.bf16.msra.mxu0 %v1618_v50  ;;  %v1705_v50 = vpack.c.bf16 %v550_v46, %v549_v45 }
  0x77   :  { %1643 = vmatpush3.bf16.msra.mxu1 %v1642_v53  ;;  %1644 = vmatprep.subr.bf16.mxu0 %v1896_v0  ;;  %v552_v53 = vld [vmem:[#allocation7 + $0x58] sm:$0xff] }
  0x78   :  { %1668 = vmatprep.subr.bf16.mxu1 %v1896_v0  ;;  %v1708_v54 = vpack.c.bf16 %v552_v53, %v551_v52  ;;  %v819_v52 = vld [vmem:[#allocation7 + $0x1b0] sm:$0xff]  ;;  %v820_v53 = vld [vmem:[#allocation7 + $0x1b8] sm:$0xff] }
  0x79   :  { %1301 = vmatmul.mubr.f32.vlgmr.msra.gmra.mrb[2].mxu0 %v268_v58  ;;  %v1684_v58 = vpack.c.bf16 %v569_v56, %v568_v55  ;;  %v1750_v55 = vpack.c.bf16 %v820_v53, %v819_v52  ;;  %v727_v56 = vld [vmem:[#allocation7 + $0x130] sm:$0xff] }
  0x7a   :  { %1646 = vmatpush3.bf16.msra.mxu0 %v1645_v59  ;;  %1336 = vmatmul.mubr.f32.vlgmr.msra.gmra.mrb[2].mxu1 %v361_v60  ;;  %v554_v59 = vld [vmem:[#allocation7 + $0x68] sm:$0xff] }
  0x7b   :  { %1647 = vmatprep.subr.bf16.mxu0 %v1896_v0  ;;  %1370 = vmatprep.mubr.msk.f32.mxu0 %vm1897_vm0, %v1898_v1  ;;  %v1711_v60 = vpack.c.bf16 %v554_v59, %v553_v57  ;;  %v728_v57 = vld [vmem:[#allocation7 + $0x138] sm:$0xff]  ;;  %v822_v59 = vld [vmem:[#allocation7 + $0x1c8] sm:$0xff] }
  0x7c   :  { %1405 = vmatprep.mubr.msk.f32.mxu1 %vm1897_vm0, %v1898_v1  ;;  %1670 = vmatpush3.bf16.msra.mxu1 %v1669_v27  ;;  %v1741_v27 = vpack.c.bf16 %v814_v25, %v813_v23  ;;  %v906_v23 = vld [vmem:[#allocation7 + $0x208] sm:$0xff] }
  0x7d   :  { %1671 = vmatprep.subr.bf16.mxu1 %v1896_v0 }
  0x7e   :  { %1649 = vmatpush3.bf16.msra.mxu0 %v1648_v39  ;;  %v555_v39 = vld [vmem:[#allocation7 + $0x70] sm:$0xff] }
  0x7f   :  { %1650 = vmatprep.subr.bf16.mxu0 %v1896_v0 }
  0x80   :  { %1673 = vmatpush3.bf16.msra.mxu1 %v1672_v31  ;;  %v815_v31 = vld [vmem:[#allocation7 + $0x190] sm:$0xff] }
  0x81   :  { %1674 = vmatprep.subr.bf16.mxu1 %v1896_v0 }
  0x82   :  { %1652 = vmatpush3.bf16.msra.mxu0 %v1651_v2  ;;  %v1714_v2 = vpack.c.bf16 %v556_v63, %v555_v39  ;;  %v730_v39 = vld [vmem:[#allocation7 + $0x148] sm:$0xff]  ;;  %v824_v63 = vld [vmem:[#allocation7 + $0x1d8] sm:$0xff] }
  0x83   :  { %1653 = vmatprep.subr.bf16.mxu0 %v1896_v0 }
  0x84   :  { %1676 = vmatpush3.bf16.msra.mxu1 %v1675_v36 }
  0x85   :  { %1677 = vmatprep.subr.bf16.mxu1 %v1896_v0 }
  0x86   :  { %1655 = vmatpush3.bf16.msra.mxu0 %v1654_v6  ;;  %v1690_v6 = vpack.c.bf16 %v573_v5, %v572_v3  ;;  %v731_v5 = vld [vmem:[#allocation7 + $0x150] sm:$0xff] }
  0x87   :  { %1656 = vmatprep.subr.bf16.mxu0 %v1896_v0 }
  0x88   :  { %1679 = vmatpush3.bf16.msra.mxu1 %v1678_v44 }
  0x89   :  { %1680 = vmatprep.subr.bf16.mxu1 %v1896_v0 }
  0x8a   :  { %1658 = vmatpush3.bf16.msra.mxu0 %v1657_v9 }
  0x8b   :  { %1659 = vmatprep.subr.bf16.mxu0 %v1896_v0 }
  0x8c   :  { %1682 = vmatpush3.bf16.msra.mxu1 %v1681_v51  ;;  %v726_v51 = vld [vmem:[#allocation7 + $0x128] sm:$0xff] }
  0x8d   :  { %1683 = vmatprep.subr.bf16.mxu1 %v1896_v0 }
  0x8e   :  { %1661 = vmatpush3.bf16.msra.mxu0 %v1660_v12 }
  0x8f   :  { %1662 = vmatprep.subr.bf16.mxu0 %v1896_v0 }
  0x90   :  { %1685 = vmatpush3.bf16.msra.mxu1 %v1684_v58  ;;  %v821_v58 = vld [vmem:[#allocation7 + $0x1c0] sm:$0xff] }
  0x91   :  { %1686 = vmatprep.subr.bf16.mxu1 %v1896_v0  ;;  %v1753_v61 = vpack.c.bf16 %v822_v59, %v821_v58 }
  0x92   :  { %1664 = vmatpush3.bf16.msra.mxu0 %v1663_v15 }
  0x93   :  { %1665 = vmatprep.subr.bf16.mxu0 %v1896_v0 }
  0x94   :  { %1688 = vmatpush3.bf16.msra.mxu1 %v1687_v40  ;;  %v823_v40 = vld [vmem:[#allocation7 + $0x1d0] sm:$0xff] }
  0x95   :  { %1689 = vmatprep.subr.bf16.mxu1 %v1896_v0  ;;  %v1756_v3 = vpack.c.bf16 %v824_v63, %v823_v40  ;;  %v1027_v40 = vld [vmem:[%s2154_s4] ss:$0 sm:$0xff] }
  0x96   :  { %1667 = vmatpush3.bf16.msra.mxu0 %v1666_v18 }
  0x97   :  { %1692 = vmatprep.subr.bf16.mxu0 %v1896_v0 }
  0x98   :  { %1691 = vmatpush3.bf16.msra.mxu1 %v1690_v6  ;;  %v732_v6 = vld [vmem:[#allocation7 + $0x158] sm:$0xff] }
  0x99   :  { %1371 = vmatmul.mubr.f32.vlgmr.msra.gmra.mrb[4].mxu0 %v2004_v49  ;;  %v545_v49 = vld [vmem:[#allocation7 + $0x20] sm:$0xff]  ;;  %1716 = vmatprep.subr.bf16.mxu1 %v1896_v0 }
  0x9a   :  { %1440 = vmatprep.mubr.msk.f32.mxu0 %vm1897_vm0, %v1898_v1  ;;  %1694 = vmatpush3.bf16.msra.mxu0 %v1693_v22  ;;  %v1699_v35 = vpack.c.bf16 %v546_v32, %v545_v49  ;;  %v816_v49 = vld [vmem:[#allocation7 + $0x198] sm:$0xff] }
  0x9b   :  { %1695 = vmatprep.subr.bf16.mxu0 %v1896_v0  ;;  %v1744_v37 = vpack.c.bf16 %v816_v49, %v815_v31 }
  0x9e   :  { %1697 = vmatpush3.bf16.msra.mxu0 %v1696_v30  ;;  %v722_v30 = vld [vmem:[#allocation7 + $0x108] sm:$0xff] }
  0x9f   :  { %1698 = vmatprep.subr.bf16.mxu0 %v1896_v0  ;;  %v1717_v36 = vpack.c.bf16 %v722_v30, %v721_v28  ;;  %v908_v30 = vld [vmem:[#allocation7 + $0x218] sm:$0xff] }
  0xa2   :  { %1700 = vmatpush3.bf16.msra.mxu0 %v1699_v35 }
  0xa3   :  { %1701 = vmatprep.subr.bf16.mxu0 %v1896_v0 }
  0xa6   :  { %1703 = vmatpush3.bf16.msra.mxu0 %v1702_v43  ;;  %v818_v43 = vld [vmem:[#allocation7 + $0x1a8] sm:$0xff] }
  0xa7   :  { %1704 = vmatprep.subr.bf16.mxu0 %v1896_v0  ;;  %v1747_v48 = vpack.c.bf16 %v818_v43, %v817_v42  ;;  %v1777_v42 = vpack.c.bf16 %v914_v41, %v913_v38  ;;  %v916_v43 = vld [vmem:[#allocation7 + $0x258] sm:$0xff] }
  0xaa   :  { %1706 = vmatpush3.bf16.msra.mxu0 %v1705_v50  ;;  %v725_v50 = vld [vmem:[#allocation7 + $0x120] sm:$0xff] }
  0xab   :  { %1707 = vmatprep.subr.bf16.mxu0 %v1896_v0 }
  0xae   :  { %1709 = vmatpush3.bf16.msra.mxu0 %v1708_v54  ;;  %v1723_v54 = vpack.c.bf16 %v726_v51, %v725_v50  ;;  %v920_v50 = vld [vmem:[#allocation7 + $0x278] sm:$0xff] }
  0xaf   :  { %1710 = vmatprep.subr.bf16.mxu0 %v1896_v0 }
  0xb2   :  { %1712 = vmatpush3.bf16.msra.mxu0 %v1711_v60  ;;  %v1726_v60 = vpack.c.bf16 %v728_v57, %v727_v56 }
  0xb3   :  { %1713 = vmatprep.subr.bf16.mxu0 %v1896_v0 }
  0xb6   :  { %1715 = vmatpush3.bf16.msra.mxu0 %v1714_v2  ;;  %v1729_v2 = vpack.c.bf16 %v730_v39, %v729_v62 }
  0xb7   :  { %1740 = vmatprep.subr.bf16.mxu0 %v1896_v0 }
 0x12c   :  { %v174_v7 = vpop.f32.mrb[0].mxu0 }
 0x12d   :  { %v1232_v8 = vpop.f32.mrb[1].mxu0  ;;  %v244_v9 = vpop.f32.mrb[0].mxu1 }
 0x12e   :  { %v245_v10 = vadd.f32 %v244_v9, %v174_v7  ;;  %v1267_v11 = vpop.f32.mrb[1].mxu1  ;;  %v825_v7 = vld [vmem:[#allocation7 + $0x1e0] sm:$0xff]  ;;  %v826_v8 = vld [vmem:[#allocation7 + $0x1e8] sm:$0xff]  ;;  %v1732_v9 = vpack.c.bf16 %v732_v6, %v731_v5 }
 0x12f   :  { %v733_v11 = vld [vmem:[#allocation7 + $0x160] sm:$0xff] }
 0x14c   :  { %v336_v12 = vpop.f32.mrb[2].mxu0 }
 0x14d   :  { %v340_v13 = vadd.f32 %v336_v12, %v245_v10  ;;  %v1302_v14 = vpop.f32.mrb[3].mxu0  ;;  %v429_v15 = vpop.f32.mrb[2].mxu1  ;;  %v1759_v10 = vpack.c.bf16 %v826_v8, %v825_v7  ;;  %v734_v12 = vld [vmem:[#allocation7 + $0x168] sm:$0xff] }
 0x14e   :  { %v1337_v16 = vpop.f32.mrb[3].mxu1  ;;  %v828_v14 = vld [vmem:[#allocation7 + $0x1f8] sm:$0xff] }
 0x14f   :  { %v433_v17 = vadd.f32 %v429_v15, %v340_v13  ;;  %v827_v13 = vld [vmem:[#allocation7 + $0x1f0] sm:$0xff]  ;;  %v1735_v15 = vpack.c.bf16 %v734_v12, %v733_v11 }
 0x150   :  { %v1762_v16 = vpack.c.bf16 %v828_v14, %v827_v13 }
 0x16c   :  { %v522_v18 = vpop.f32.mrb[4].mxu0 }
 0x16d   :  { %v526_v20 = vadd.f32 %v522_v18, %v433_v17  ;;  %v1372_v21 = vpop.f32.mrb[5].mxu0  ;;  %v735_v17 = vld [vmem:[#allocation7 + $0x170] sm:$0xff]  ;;  %v736_v18 = vld [vmem:[#allocation7 + $0x178] sm:$0xff] }
 0x16e   :  { %v1738_v21 = vpack.c.bf16 %v736_v18, %v735_v17 }
 0x16f   :  { %v534_v22 = vadd.f32 %v1024_v19, %v526_v20 }
 0x171   :  { %v535_v26 = vmax.f32 %v534_v22, 0.0  ;;  %v905_v22 = vld [vmem:[#allocation7 + $0x200] sm:$0xff] }
 0x172   :  { %v1765_v28 = vpack.c.bf16 %v906_v23, %v905_v22 }
 0x173   :  { %v537_v29 = vrot.slane %v535_v26, 6 }
 0x175   :  { %v2084_v32 = vsel %vm65_vm1, 0.0, %v537_v29  ;;  %v2087_v33 = vsel %vm65_vm1, %v537_v29, 0.0  ;;  %1441 = vmatmul.mubr.msk.f32.vlgmr.msra.gmra.mrb[6].mxu0 %vm2015_vm4, %v537_v29  ;;  %v907_v29 = vld [vmem:[#allocation7 + $0x210] sm:$0xff] }
 0x176   :  { %1742 = vmatpush3.bf16.msra.mxu0 %v1741_v27  ;;  %v576_v34 = vrot.slane %v2084_v32, 1  ;;  %v577_v35 = vrot.slane %v2087_v33, 1  ;;  %1510 = vmatprep.mubr.msk.f32.mxu0 %vm1897_vm0, %v1898_v1  ;;  %v921_v44 = vrot.slane %v2084_v32, 4  ;;  %v922_v4 = vrot.slane %v2087_v33, 4 }
 0x177   :  { %1743 = vmatprep.subr.bf16.mxu0 %v1896_v0  ;;  %v829_v19 = vrot.slane %v2084_v32, 3  ;;  %v830_v20 = vrot.slane %v2087_v33, 3  ;;  %v737_v26 = vrot.slane %v2084_v32, 2  ;;  %v738_v27 = vrot.slane %v2087_v33, 2  ;;  %v909_v32 = vld [vmem:[#allocation7 + $0x220] sm:$0xff] }
 0x178   :  { %v578_v45 = vsel %vm103_vm3, %v576_v34, %v577_v35  ;;  %v2100_v46 = vsel %vm451_vm2, %v921_v44, %v922_v4  ;;  %v1768_v49 = vpack.c.bf16 %v908_v30, %v907_v29  ;;  %v910_v34 = vld [vmem:[#allocation7 + $0x228] sm:$0xff]  ;;  %v911_v35 = vld [vmem:[#allocation7 + $0x230] sm:$0xff]  ;;  %v917_v4 = vld [vmem:[#allocation7 + $0x260] sm:$0xff] }
 0x179   :  { %1406 = vmatmul.mubr.f32.vlgmr.msra.gmra.mrb[4].mxu1 %v578_v45  ;;  %v831_v25 = vsel %vm358_vm6, %v829_v19, %v830_v20  ;;  %v739_v31 = vsel %vm265_vm5, %v737_v26, %v738_v27  ;;  %v1771_v33 = vpack.c.bf16 %v910_v34, %v909_v32  ;;  %v918_v45 = vld [vmem:[#allocation7 + $0x268] sm:$0xff] }
 0x17a   :  { %1718 = vmatpush3.bf16.msra.mxu1 %v1717_v36  ;;  %1745 = vmatpush3.bf16.msra.mxu0 %v1744_v37  ;;  %v912_v36 = vld [vmem:[#allocation7 + $0x238] sm:$0xff] }
 0x17b   :  { %1719 = vmatprep.subr.bf16.mxu1 %v1896_v0  ;;  %1746 = vmatprep.subr.bf16.mxu0 %v1896_v0  ;;  %v1774_v37 = vpack.c.bf16 %v912_v36, %v911_v35 }
 0x17c   :  { %1475 = vmatprep.mubr.msk.f32.mxu1 %vm1897_vm0, %v1898_v1 }
 0x17e   :  { %1721 = vmatpush3.bf16.msra.mxu1 %v1720_v47  ;;  %1748 = vmatpush3.bf16.msra.mxu0 %v1747_v48  ;;  %v1783_v47 = vpack.c.bf16 %v918_v45, %v917_v4  ;;  %v919_v48 = vld [vmem:[#allocation7 + $0x270] sm:$0xff] }
 0x17f   :  { %1722 = vmatprep.subr.bf16.mxu1 %v1896_v0  ;;  %1749 = vmatprep.subr.bf16.mxu0 %v1896_v0  ;;  %v1786_v51 = vpack.c.bf16 %v920_v50, %v919_v48 }
 0x182   :  { %1724 = vmatpush3.bf16.msra.mxu1 %v1723_v54  ;;  %1751 = vmatpush3.bf16.msra.mxu0 %v1750_v55 }
 0x183   :  { %1725 = vmatprep.subr.bf16.mxu1 %v1896_v0  ;;  %1752 = vmatprep.subr.bf16.mxu0 %v1896_v0 }
 0x186   :  { %1727 = vmatpush3.bf16.msra.mxu1 %v1726_v60  ;;  %1754 = vmatpush3.bf16.msra.mxu0 %v1753_v61 }
 0x187   :  { %1728 = vmatprep.subr.bf16.mxu1 %v1896_v0  ;;  %1755 = vmatprep.subr.bf16.mxu0 %v1896_v0 }
 0x18a   :  { %1730 = vmatpush3.bf16.msra.mxu1 %v1729_v2  ;;  %1757 = vmatpush3.bf16.msra.mxu0 %v1756_v3 }
 0x18b   :  { %1731 = vmatprep.subr.bf16.mxu1 %v1896_v0  ;;  %1758 = vmatprep.subr.bf16.mxu0 %v1896_v0 }
 0x18e   :  { %1733 = vmatpush3.bf16.msra.mxu1 %v1732_v9  ;;  %1760 = vmatpush3.bf16.msra.mxu0 %v1759_v10 }
 0x18f   :  { %1734 = vmatprep.subr.bf16.mxu1 %v1896_v0  ;;  %1761 = vmatprep.subr.bf16.mxu0 %v1896_v0 }
 0x192   :  { %1736 = vmatpush3.bf16.msra.mxu1 %v1735_v15  ;;  %1763 = vmatpush3.bf16.msra.mxu0 %v1762_v16 }
 0x193   :  { %1737 = vmatprep.subr.bf16.mxu1 %v1896_v0 }
 0x195   :  { %1511 = vmatmul.mubr.f32.vlgmr.msra.gmra.mrb[8].mxu0 %v831_v25 }
 0x196   :  { %1739 = vmatpush3.bf16.msra.mxu1 %v1738_v21 }
 0x197   :  { %1764 = vmatprep.subr.bf16.mxu1 %v1896_v0 }
 0x199   :  { %1476 = vmatmul.mubr.f32.vlgmr.msra.gmra.mrb[6].mxu1 %v739_v31 }
 0x19a   :  { %1766 = vmatpush3.bf16.msra.mxu1 %v1765_v28  ;;  %1545 = vmatprep.mubr.msk.f32.mxu1 %vm1897_vm0, %v1898_v1  ;;  %v915_v1 = vld [vmem:[#allocation7 + $0x250] sm:$0xff] }
 0x19b   :  { %1767 = vmatprep.subr.bf16.mxu1 %v1896_v0  ;;  %v1780_v44 = vpack.c.bf16 %v916_v43, %v915_v1 }
 0x19e   :  { %1769 = vmatpush3.bf16.msra.mxu1 %v1768_v49 }
 0x19f   :  { %1770 = vmatprep.subr.bf16.mxu1 %v1896_v0 }
 0x1a2   :  { %1772 = vmatpush3.bf16.msra.mxu1 %v1771_v33 }
 0x1a3   :  { %1773 = vmatprep.subr.bf16.mxu1 %v1896_v0 }
 0x1a6   :  { %1775 = vmatpush3.bf16.msra.mxu1 %v1774_v37 }
 0x1a7   :  { %1776 = vmatprep.subr.bf16.mxu1 %v1896_v0 }
 0x1aa   :  { %1778 = vmatpush3.bf16.msra.mxu1 %v1777_v42 }
 0x1ab   :  { %1779 = vmatprep.subr.bf16.mxu1 %v1896_v0 }
 0x1ae   :  { %1781 = vmatpush3.bf16.msra.mxu1 %v1780_v44 }
 0x1af   :  { %1782 = vmatprep.subr.bf16.mxu1 %v1896_v0 }
 0x1b2   :  { %1784 = vmatpush3.bf16.msra.mxu1 %v1783_v47 }
 0x1b3   :  { %1785 = vmatprep.subr.bf16.mxu1 %v1896_v0 }
 0x1b6   :  { %1787 = vmatpush3.bf16.msra.mxu1 %v1786_v51 }
 0x1b9   :  { %1546 = vmatmul.mubr.f32.vlgmr.msra.gmra.mrb[8].mxu1 %v2100_v46 }
 0x248   :  { %v716_v52 = vpop.f32.mrb[6].mxu0 }
 0x249   :  { %v1442_v53 = vpop.f32.mrb[7].mxu0 }
 0x24c   :  { %v646_v54 = vpop.f32.mrb[4].mxu1 }
 0x24d   :  { %v717_v55 = vadd.f32 %v716_v52, %v646_v54  ;;  %v1407_v56 = vpop.f32.mrb[5].mxu1 }
 0x268   :  { %v899_v57 = vpop.f32.mrb[8].mxu0 }
 0x269   :  { %v1512_v58 = vpop.f32.mrb[9].mxu0 }
 0x26c   :  { %v807_v59 = vpop.f32.mrb[6].mxu1 }
 0x26d   :  { %v811_v60 = vadd.f32 %v807_v59, %v717_v55  ;;  %v1477_v61 = vpop.f32.mrb[7].mxu1 }
 0x26f   :  { %v903_v62 = vadd.f32 %v899_v57, %v811_v60 }
 0x28c   :  { %v991_v39 = vpop.f32.mrb[8].mxu1 }
 0x28d   :  { %v995_v0 = vadd.f32 %v991_v39, %v903_v62  ;;  %v1547_v63 = vpop.f32.mrb[9].mxu1 }
 0x28f   :  { %v1003_v46 = vadd.f32 %v1027_v40, %v995_v0 }
 0x291   :  { %v1004_v2 = vadd.f32 %v1003_v46, %v1982_v24 }
 0x293   :  { %1005 = vst [vmem:[#allocation8] sm:$0xff] %v1004_v2 }
 0x294   :  { %1874 = shalt.err (!%p1871_p0)
}
 0x295   :  { %s1875_s4 = scalar_lea.hbm %s2155_s5, 128 }
 0x296   :  { %p1876_p1 = scmp.ne.s32.totalorder %s2155_s5, %s1875_s4  ;;  %p1879_p2 = scmp.lt.u32.totalorder %s1875_s4, %s2155_s5 }
 0x298   :  { %p1881_p3 = pnand %p1879_p2, %p1876_p1 }
 0x29a   :  { %1884 = shalt.err (!%p1881_p3)
}
 0x29b   :  { %1015 = dma.vmem_to_hbm [thread:$0]  %s1013_s7, 128, %s2155_s5, [#allocation4]  }
 0x29c   :  { %1889 = dma.done.wait [#allocation4], 128  }
 0x29d   :  { %1890 = vsyncadd [#allocation4], 4294967168 }
 0x29e   :  { %1019 = vsyncpa [#allocation3], 1 }
 0x29f   :  { %1020 = vsyncpa [#allocation6], 1 }
 0x2a0   :  { %1021 = vsyncpa [#allocation4], 1 }

</bundles_post_ra>
